<compile_context>
chip_gen: v7x
topology: tpu7x:2x2x1
jax: 0.10.0
libtpu: 0.0.40
codegen_flags: <defaults>
</compile_context>

<pallas_src>
import functools

import jax
import jax.numpy as jnp
from jax.experimental import pallas as pl
from jax.experimental.pallas import tpu as pltpu


_TARGET_BLOCK_BYTES = 3 * 1024 * 1024   # ~3 MiB input block -> near HBM roofline
_SMALL_HW = 512                         # below this, batch several images per block
_MXU_MIN_C = 64                         # offload channel sums to MXU for large C


def _layernorm2d_kernel(x_ref, w_ref, b_ref, o_ref, *, eps, inv_c, use_mxu):
    # x_ref / o_ref: (C, T) block (batch dim squeezed)  OR  (n_b, C, HW) block.
    # w_ref / b_ref: (C, 1) or (1, C, 1); grid-invariant, fetched once.
    x = x_ref[...].astype(jnp.float32)
    w = w_ref[...].astype(jnp.float32)
    b = b_ref[...].astype(jnp.float32)

    if use_mxu:
        # Channel reduction on the (otherwise idle) MXU; HIGHEST precision keeps
        # the f32 operands un-truncated.  Squares are computed on the f32 upcast.
        ones = jnp.ones((1, x.shape[0]), jnp.float32)
        mu = inv_c * jnp.dot(ones, x,
                             precision=jax.lax.Precision.HIGHEST,
                             preferred_element_type=jnp.float32)        # (1, T)
        d = x - mu
        var = inv_c * jnp.dot(ones, d * d,
                              precision=jax.lax.Precision.HIGHEST,
                              preferred_element_type=jnp.float32)       # (1, T)
    else:
        mu = inv_c * jnp.sum(x, axis=-2, keepdims=True)
        d = x - mu
        var = inv_c * jnp.sum(d * d, axis=-2, keepdims=True)

    inv_std = jax.lax.rsqrt(var + eps)          # EUP, off the VALU path
    o_ref[...] = (d * inv_std * w + b).astype(o_ref.dtype)


def layernorm2d(x, weight, bias, eps=1e-6,
                target_block_bytes=_TARGET_BLOCK_BYTES):
    """x: (B, C, H, W) NCHW; weight/bias: (C,).  Returns (B, C, H, W) in x.dtype."""
    B, C, H, W = x.shape
    HW = H * W
    itemsize = jnp.dtype(x.dtype).itemsize
    x2 = x.reshape(B, C, HW)

    if HW >= _SMALL_HW:
        # ---- Path A: squeeze batch, tile the spatial axis lane-dense. -------
        t = max(1, target_block_bytes // (C * itemsize))
        if t >= HW:
            t_hw = HW
        else:
            t_hw = max(128, (t // 128) * 128)
        n_hw = pl.cdiv(HW, t_hw)
        if B == 1 and n_hw == 1:
            # Keep both v7x TensorCores busy: split into >= 2 spatial blocks.
            t_hw = 128 * pl.cdiv(HW, 256)
            n_hw = pl.cdiv(HW, t_hw)
        grid = (B, n_hw)
        in_specs = [
            pl.BlockSpec((None, C, t_hw), lambda bi, s: (bi, 0, s)),
            pl.BlockSpec((C, 1), lambda bi, s: (0, 0)),
            pl.BlockSpec((C, 1), lambda bi, s: (0, 0)),
        ]
        out_specs = pl.BlockSpec((None, C, t_hw), lambda bi, s: (bi, 0, s))
        w2 = weight.reshape(C, 1)
        b2 = bias.reshape(C, 1)
        dims = ("parallel", "parallel")
        use_mxu = C >= _MXU_MIN_C
        blk_elems = C * t_hw
    else:
        # ---- Path B: small spatial extent -> pack several images per block. -
        per_img = C * HW * itemsize
        n_b = max(1, min(B, target_block_bytes // max(1, per_img)))
        while B % n_b:              # keep blocks exact (no padded batch blocks)
            n_b -= 1
        if B >= 2 and n_b == B:     # >= 2 grid steps so both v7x TCs get work
            n_b = B // 2
            while B % n_b:
                n_b -= 1
        grid = (B // n_b,)
        in_specs = [
            pl.BlockSpec((n_b, C, HW), lambda i: (i, 0, 0)),
            pl.BlockSpec((1, C, 1), lambda i: (0, 0, 0)),
            pl.BlockSpec((1, C, 1), lambda i: (0, 0, 0)),
        ]
        out_specs = pl.BlockSpec((n_b, C, HW), lambda i: (i, 0, 0))
        w2 = weight.reshape(1, C, 1)
        b2 = bias.reshape(1, C, 1)
        dims = ("parallel",)
        use_mxu = False
        blk_elems = n_b * C * HW

    # VMEM budget: 2x double-buffered input + 2x output blocks, plus ~3 f32
    # temporaries live during compute.  Cap at 64 MiB (v7x physical per TC);
    # the explicit limit also lifts v5e's 16 MiB scoped default.
    io_bytes = blk_elems * itemsize
    vmem_needed = 4 * io_bytes + 3 * blk_elems * 4
    vmem_limit = int(min(64 * 1024 * 1024,
                         max(32 * 1024 * 1024, int(1.5 * vmem_needed))))

    kernel = functools.partial(_layernorm2d_kernel, eps=float(eps),
                               inv_c=1.0 / C, use_mxu=use_mxu)

    out = pl.pallas_call(
        kernel,
        out_shape=jax.ShapeDtypeStruct((B, C, HW), x.dtype),
        grid_spec=pltpu.PrefetchScalarGridSpec(
            num_scalar_prefetch=0,
            grid=grid,
            in_specs=in_specs,
            out_specs=out_specs,
        ),
        compiler_params=pltpu.CompilerParams(
            dimension_semantics=dims,
            vmem_limit_bytes=vmem_limit,
        ),
    )(x2, w2, b2)
    return out.reshape(B, C, H, W)


def layernorm2d_ref(x, weight, bias, eps=1e-6):
    """Pure-JAX reference mirroring the PyTorch forward (f32 math)."""
    x = x.astype(jnp.float32)
    mu = jnp.mean(x, axis=1, keepdims=True)
    sigma = jnp.mean((x - mu) ** 2, axis=1, keepdims=True)
    x_norm = (x - mu) / jnp.sqrt(sigma + eps)
    w = weight.astype(jnp.float32)[None, :, None, None]
    b = bias.astype(jnp.float32)[None, :, None, None]
    return w * x_norm + b


if __name__ == "__main__":
    key = jax.random.PRNGKey(0)

    # (B, C, H, W, dtype, tol) — covers: small-HW batched path, spatial-tiled
    # VALU path, spatial-tiled MXU-reduction path, and bf16 I/O.
    cases = [
        (2, 4, 16, 16, jnp.float32, 1e-5),
        (1, 8, 32, 32, jnp.float32, 1e-5),
        (1, 128, 32, 32, jnp.float32, 1e-4),
        (2, 4, 16, 16, jnp.bfloat16, 3e-2),
    ]

    for i, (B, C, H, W, dtype, tol) in enumerate(cases):
        k = jax.random.fold_in(key, i)
        x = jax.random.normal(k, (B, C, H, W), dtype=jnp.float32).astype(dtype)
        # Module defaults: weight=ones, bias=zeros; perturb slightly so the
        # affine part is actually exercised.
        weight = jnp.ones((C,), jnp.float32) + 0.1 * jnp.arange(C, dtype=jnp.float32) / C
        bias = 0.05 * jnp.arange(C, dtype=jnp.float32) / C

        out = layernorm2d(x, weight, bias)
        out = jax.block_until_ready(out)

        ref = layernorm2d_ref(x, weight, bias)
        assert out.shape == (B, C, H, W), f"shape mismatch, case {i}"
        assert out.dtype == dtype, f"dtype mismatch, case {i}"
        ok = jnp.allclose(out.astype(jnp.float32), ref, atol=tol, rtol=tol)
        assert ok, f"mismatch vs reference, case {i}"

    print("KERNEL_OK")
</pallas_src>

<mosaic_0001>
module attributes {stable_mosaic.version = 11 : i64} {
  func.func @_layernorm2d_kernel(%arg0: i32, %arg1: memref<1x4x256xf32, #tpu.memory_space<vmem>>, %arg2: memref<1x4x1xf32, #tpu.memory_space<vmem>>, %arg3: memref<1x4x1xf32, #tpu.memory_space<vmem>>, %arg4: memref<1x4x256xf32, #tpu.memory_space<vmem>>) attributes {dimension_semantics = [#tpu.dimension_semantics<parallel>], iteration_bounds = array<i64: 2>, scalar_prefetch = 0 : i64, scratch_operands = 0 : i64, tpu.core_type = #tpu.core_type<tc>, window_params = [{transform_indices = @transform_0, window_bounds = array<i64: 1, 4, 256>}, {pipeline_mode = #tpu.pipeline_mode<synchronous>, transform_indices = @transform_1, window_bounds = array<i64: 1, 4, 1>}, {pipeline_mode = #tpu.pipeline_mode<synchronous>, transform_indices = @transform_2, window_bounds = array<i64: 1, 4, 1>}, {transform_indices = @transform_3, window_bounds = array<i64: 1, 4, 256>}]} {
    %c0 = arith.constant 0 : index
    %c0_0 = arith.constant 0 : index
    %c0_1 = arith.constant 0 : index
    %0 = vector.load %arg1[%c0, %c0_0, %c0_1] : memref<1x4x256xf32, #tpu.memory_space<vmem>>, vector<1x4x256xf32>
    %c0_2 = arith.constant 0 : index
    %c0_3 = arith.constant 0 : index
    %c0_4 = arith.constant 0 : index
    %1 = vector.load %arg2[%c0_2, %c0_3, %c0_4] : memref<1x4x1xf32, #tpu.memory_space<vmem>>, vector<1x4x1xf32>
    %c0_5 = arith.constant 0 : index
    %c0_6 = arith.constant 0 : index
    %c0_7 = arith.constant 0 : index
    %2 = vector.load %arg3[%c0_5, %c0_6, %c0_7] : memref<1x4x1xf32, #tpu.memory_space<vmem>>, vector<1x4x1xf32>
    %cst = arith.constant dense<0.000000e+00> : vector<1x256xf32>
    %3 = vector.multi_reduction <add>, %0, %cst [1] : vector<1x4x256xf32> to vector<1x256xf32>
    %4 = vector.shape_cast %3 : vector<1x256xf32> to vector<1x1x256xf32>
    %cst_8 = arith.constant 2.500000e-01 : f32
    %5 = vector.broadcast %cst_8 : f32 to vector<1x1x256xf32>
    %6 = arith.mulf %5, %4 : vector<1x1x256xf32>
    %7 = vector.broadcast %6 : vector<1x1x256xf32> to vector<1x4x256xf32>
    %8 = arith.subf %0, %7 : vector<1x4x256xf32>
    %9 = arith.mulf %8, %8 : vector<1x4x256xf32>
    %cst_9 = arith.constant dense<0.000000e+00> : vector<1x256xf32>
    %10 = vector.multi_reduction <add>, %9, %cst_9 [1] : vector<1x4x256xf32> to vector<1x256xf32>
    %11 = vector.shape_cast %10 : vector<1x256xf32> to vector<1x1x256xf32>
    %cst_10 = arith.constant 2.500000e-01 : f32
    %12 = vector.broadcast %cst_10 : f32 to vector<1x1x256xf32>
    %13 = arith.mulf %12, %11 : vector<1x1x256xf32>
    %cst_11 = arith.constant 9.99999997E-7 : f32
    %14 = vector.broadcast %cst_11 : f32 to vector<1x1x256xf32>
    %15 = arith.addf %13, %14 : vector<1x1x256xf32>
    %16 = math.rsqrt %15 : vector<1x1x256xf32>
    %17 = vector.broadcast %16 : vector<1x1x256xf32> to vector<1x4x256xf32>
    %18 = arith.mulf %8, %17 : vector<1x4x256xf32>
    %19 = vector.broadcast %1 : vector<1x4x1xf32> to vector<1x4x256xf32>
    %20 = arith.mulf %18, %19 : vector<1x4x256xf32>
    %21 = vector.broadcast %2 : vector<1x4x1xf32> to vector<1x4x256xf32>
    %22 = arith.addf %20, %21 : vector<1x4x256xf32>
    %c0_12 = arith.constant 0 : index
    %c0_13 = arith.constant 0 : index
    %c0_14 = arith.constant 0 : index
    %23 = vector.load %arg4[%c0_12, %c0_13, %c0_14] : memref<1x4x256xf32, #tpu.memory_space<vmem>>, vector<1x4x256xf32>
    tpu.vector_store %arg4[%c0_12, %c0_13, %c0_14], %22 {strides = array<i32>} : memref<1x4x256xf32, #tpu.memory_space<vmem>>, vector<1x4x256xf32>,
    return
  }
  func.func @transform_0(%arg0: i32) -> (i32, i32, i32) {
    %c0_i32 = arith.constant 0 : i32
    %c0_i32_0 = arith.constant 0 : i32
    %c0_i32_1 = arith.constant 0 : i32
    return %arg0, %c0_i32, %c0_i32_0 : i32, i32, i32
  }
  func.func @transform_1(%arg0: i32) -> (i32, i32, i32) {
    %c0_i32 = arith.constant 0 : i32
    %c0_i32_0 = arith.constant 0 : i32
    %c0_i32_1 = arith.constant 0 : i32
    %c0_i32_2 = arith.constant 0 : i32
    return %c0_i32, %c0_i32_0, %c0_i32_1 : i32, i32, i32
  }
  func.func @transform_2(%arg0: i32) -> (i32, i32, i32) {
    %c0_i32 = arith.constant 0 : i32
    %c0_i32_0 = arith.constant 0 : i32
    %c0_i32_1 = arith.constant 0 : i32
    %c0_i32_2 = arith.constant 0 : i32
    return %c0_i32, %c0_i32_0, %c0_i32_1 : i32, i32, i32
  }
  func.func @transform_3(%arg0: i32) -> (i32, i32, i32) {
    %c0_i32 = arith.constant 0 : i32
    %c0_i32_0 = arith.constant 0 : i32
    %c0_i32_1 = arith.constant 0 : i32
    return %arg0, %c0_i32, %c0_i32_0 : i32, i32, i32
  }
}

</mosaic_0001>

<bundles_post_ra>
// kernel: tpu_custom_call.1
= control target key start
LH: loop header
LB: loop body
LE: loop exit
PB: predicated region body
PF: predicated region fallthrough
CT: control target
= control target key end

     0   :  { %8 = vsyncpa [#allocation3], 0  ;;  %s723_s0 = inlined_call_operand.hbm [shape: f32[2,4,256], index: 0, kind: input, shape index: {}]   ;;  %s724_s1 = inlined_call_operand.vmem [shape: f32[1,4,1], index: 1, kind: input, shape index: {}]   ;;  %s725_s2 = inlined_call_operand.vmem [shape: f32[1,4,1], index: 2, kind: input, shape index: {}]   ;;  %s726_s3 = inlined_call_operand.hbm [shape: f32[2,4,256], index: 3, kind: output, shape index: {}]  }
   0x1   :  { %10 = vsyncpa [#allocation3 + $0x1], 0 }
   0x2   :  { %11 = vsyncpa [#allocation4], 0 }
   0x3   :  { %13 = vsyncpa [#allocation4 + $0x1], 0  ;;  %s548_s12 = smov 0   ;;  %s550_s13 = smov 0  }
   0x4   :  { %s552_s14 = smov 0   ;;  %s554_s15 = smov 0  }
   0x5 LB: > { %s569_s16 = sadd.s32 4294967295, %s522_s15   ;;  %s356_s17 = sadd.s32 4294967294, %s522_s15   ;;  %s522_s15 = sphi %s554_s15, %s741_s15   ;;  %s518_s14 = sphi %s552_s14, %s740_s14   ;;  %s514_s13 = sphi %s550_s13, %s739_s13   ;;  %s510_s12 = sphi %s548_s12, %s738_s12  }
   0x6   : > { %s573_s18 = sadd.s32 1, %s522_s15   ;;  %s26_s19 = sadd.s32 1, %s518_s14 }
   0x7   : > { %s23_s20 = ssub.s32 %s522_s15, %s573_s18  ;;  %p33_p0 = scmp.ne.s32.totalorder %s518_s14, %s514_s13 }
   0x8   : > { %p24_p1 = scmp.eq.s32.totalorder %s23_s20, 0  ;;  %p34_p2 = scmp.eq.s32.totalorder %s522_s15, 0 }
   0x9   : > { %p39_p3 = scmp.ne.s32.totalorder %s514_s13, %s510_s12  ;;  %p40_p4 = scmp.eq.s32.totalorder %s569_s16, 0 }
   0xa   : > { %s585_s21 = scalar_select %p24_p1, %s518_s14, %s26_s19  }
   0xb   : > { %p587_p5 = por %p34_p2, %p33_p0  ;;  %p591_p6 = por %p40_p4, %p39_p3 }
   0xc   : > { %p105_p7 = scmp.eq.s32.totalorder %s569_s16, 1  ;;  %p111_p8 = scmp.eq.s32.totalorder %s356_s17, 1 }
   0xd   : > { %p384_p10 = scmp.lt.s32.totalorder %s522_s15, 2  ;;  %s137_s26 = sand.u32 1, %s518_s14  }
   0xe   : > { %p598_p11 = por %p105_p7, %p33_p0  ;;  %p602_p12 = por %p111_p8, %p39_p3 }
   0xf   : > { %s370_s27 = sshll.u32 %s522_s15, 7  ;;  %s359_s28 = sshll.u32 %s137_s26, 3 }
  0x10   : > { %s730_s24 = scalar_select %p598_p11, 1, 0 }
  0x11   : > { %s731_s25 = scalar_select %p602_p12, 1, 0 }
  0x12   : > { %s611_s4 = scalar_lea.hbm %s723_s0, %s370_s27  ;;  %s141_s5 = scalar_lea.vmem [#allocation2], %s359_s28 }
  0x13   : > { %s149_s6 = sshll.u32 %s141_s5, 4  ;;  %p615_p13 = pnand %p384_p10, %p587_p5  ;;  %s619_s6 = int_to_ptr.vmem [resolvable:$true] %s149_s6 }
  0x14   : > { %s138_s8 = scalar_lea.sflag [#allocation3], %s137_s26  ;;  %s426_s9 = scalar_lea.hbm %s611_s4, 128 }
  0x15   : > { %p427_p2 = scmp.ne.s32.totalorder %s611_s4, %s426_s9  ;;  %p428_p3 = pneg %p615_p13 }
  0x16   : > { %s431_s17 = scalar_lea.hbm %s723_s0, 256  ;;  %p432_p5 = scmp.lt.u32.totalorder %s611_s4, %s723_s0 }
  0x17   : > { %p429_p4 = pnand %p428_p3, %p427_p2  ;;  %p433_p8 = scmp.lt.u32.totalorder %s431_s17, %s426_s9 }
  0x18   : > { %p435_p9 = scmp.lt.u32.totalorder %s426_s9, %s611_s4 }
  0x19   : > { %p430_p7 = pneg %p429_p4  ;;  %p434_p10 = por %p433_p8, %p432_p5 }
  0x1b   : > { %p436_p0 = por %p435_p9, %p434_p10 }
  0x1d   : > { %p437_p1 = pnand %p436_p0, %p430_p7 }
  0x1f   : > { %440 = shalt.err (!%p437_p1)
}
  0x20   : > { %s441_s22 = scalar_lea.vmem %s619_s6, 128  ;;  %s524_s26 = smov [#allocation2]  }
  0x21   : > { %p442_p2 = scmp.ne.s32.totalorder %s619_s6, %s441_s22  ;;  %s446_s27 = sshll.u32 %s524_s26, 4  ;;  %s447_s27 = int_to_ptr.vmem [resolvable:$false] %s446_s27 }
  0x22   : > { %s448_s28 = scalar_lea.vmem %s447_s27, 256  ;;  %p449_p11 = scmp.lt.s32.totalorder %s619_s6, %s447_s27 }
  0x23   : > { %p444_p4 = pnand %p442_p2, %p428_p3  ;;  %p450_p5 = scmp.lt.s32.totalorder %s448_s28, %s441_s22 }
  0x25   : > { %p445_p12 = pneg %p444_p4  ;;  %p451_p8 = por %p450_p5, %p449_p11 }
  0x27   : > { %p452_p9 = pnand %p451_p8, %p445_p12 }
  0x29   : > { %455 = shalt.err (!%p452_p9)
}
  0x2a   : > { %379 = dma.hbm_to_vmem [thread:$0]  (!%p615_p13), %s611_s4, 128, %s619_s6, %s138_s8  }
  0x2b   : > { %p733_p0 = scmp.lt.s32.totalorder %s522_s15, 3  ;;  %p734_p1 = scmp.ge.s32.totalorder %s522_s15, 1 }
  0x2d   : > { %p155_p3 = pnand %p734_p1, %p733_p0 }
  0x2e   : > { %s653_s29 = sand.u32 (!%p155_p3), 1, %s514_s13  }
  0x2f   : > { %158 = sbr.rel (%p155_p3) target bundleno = 207 (0xcf), region = 32  ;;  %s363_s30 = sshll.u32 (!%p155_p3), %s653_s29, 3 }
  0x30   : > { %s161_s5 = scalar_lea.sflag (!%p155_p3), [#allocation3], %s653_s29  ;;  %s164_s7 = scalar_lea.vmem (!%p155_p3), [#allocation2], %s363_s30 }
  0x36   : > { %501 = dma.done.wait (%p591_p6), %s161_s5, 128  }
  0x37   : > { %503 = vsyncadd (%p591_p6), %s161_s5, 4294967168  ;;  %v525_v0 = vmov 0   ;;  %v188_v1 = vld [vmem:[%s724_s1] sm:$0xf]  ;;  %vm193_vm0 = vcmask 1043456   ;;  %v251_v45 = vlaneseq  ;;  %s371_s23 = sshll.u32 %s569_s16, 7 }
  0x38   : > { %420 = vset.pattern.permute.xlu0 %v525_v0  ;;  %v189_v2 = vld [vmem:[%s725_s2] sm:$0xf]  ;;  %v526_v43 = vmov 839922192   ;;  %s186_s10 = scalar_lea.vmem [#allocation5], %s363_s30  ;;  %s679_s20 = scalar_lea.hbm %s726_s3, %s371_s23 }
  0x39   : > { %246 = vperm.xlu0 %420, %v188_v1   ;;  %v187_v3 = vld [vmem:[%s164_s7] sm:$0xff]  ;;  %v249_v44 = vunpack.c.l.s4 %v526_v43  ;;  %v252_v48 = vshrl.u32 %v251_v45, 7  ;;  %s286_s11 = sshll.u32 %s186_s10, 4  ;;  %s272_s22 = scalar_lea.sflag [#allocation4], %s653_s29  ;;  %s681_s11 = int_to_ptr.vmem [resolvable:$true] %s286_s11 }
  0x3a   : > { %v191_v4 = vcombine.high %v187_v3, %v187_v3  ;;  %v194_v5 = vsel %vm193_vm0, %v187_v3, 0.0  ;;  %s456_s26 = scalar_lea.vmem %s681_s11, 128  ;;  %p735_p11 = scmp.ne.s32.totalorder %s730_s24, 0 }
  0x3b   : > { %v195_v7 = vrot.slane %v194_v5, 4  ;;  %v250_v47 = vunpack.c.0.s8 %v249_v44  ;;  %p457_p6 = scmp.ne.s32.totalorder %s681_s11, %s456_s26  ;;  %s527_s16 = smov [#allocation5]  }
  0x3c   : > { %v201_v6 = vsel %vm193_vm0, %v191_v4, 0.0  ;;  %s460_s27 = sshll.u32 %s527_s16, 4  ;;  %s461_s27 = int_to_ptr.vmem [resolvable:$false] %s460_s27 }
  0x3d   : > { %259 = vperm.xlu0 %420, %v189_v2   ;;  %v202_v8 = vrot.slane %v201_v6, 4  ;;  %v196_v9 = vadd.f32 %v195_v7, %v194_v5  ;;  %v253_v50 = vsub.s32 %v250_v47, %v252_v48  ;;  %p458_p12 = pnand %p457_p6, %p735_p11  ;;  %s462_s28 = scalar_lea.vmem %s461_s27, 256 }
  0x3e   : > { %p463_p7 = scmp.lt.s32.totalorder %s681_s11, %s461_s27  ;;  %p464_p10 = scmp.lt.s32.totalorder %s462_s28, %s456_s26 }
  0x3f   : > { %v203_v10 = vadd.f32 %v202_v8, %v201_v6  ;;  %v197_v11 = vrot.slane %v196_v9, 2  ;;  %p459_p13 = pneg %p458_p12 }
  0x40   : > { %p465_p2 = por %p464_p10, %p463_p7 }
  0x41   : > { %v204_v12 = vrot.slane %v203_v10, 2  ;;  %v198_v13 = vadd.f32 %v197_v11, %v196_v9 }
  0x42   : > { %p466_p4 = pnand %p465_p2, %p459_p13 }
  0x43   : > { %v205_v14 = vadd.f32 %v204_v12, %v203_v10  ;;  %v199_v15 = vrot.slane %v198_v13, 1 }
  0x45   : > { %v206_v16 = vrot.slane %v205_v14, 1  ;;  %v200_v17 = vadd.f32 %v199_v15, %v198_v13 }
  0x47   : > { %v207_v18 = vadd.f32 %v206_v16, %v205_v14  ;;  %v208_v19 = vmul.f32 0.25, %v200_v17 }
  0x49   : > { %v209_v20 = vmul.f32 0.25, %v207_v18 }
  0x4b   : > { %v212_v21 = vcombine.low %v208_v19, %v209_v20 }
  0x4d   : > { %v214_v22 = vsub.f32 %v187_v3, %v212_v21 }
  0x4f   : > { %v215_v23 = vmul.f32 %v214_v22, %v214_v22 }
  0x51   : > { %v217_v24 = vcombine.high %v215_v23, %v215_v23  ;;  %v219_v25 = vsel %vm193_vm0, %v215_v23, 0.0 }
  0x52   : > { %v220_v27 = vrot.slane %v219_v25, 4 }
  0x53   : > { %v226_v26 = vsel %vm193_vm0, %v217_v24, 0.0 }
  0x54   : > { %v227_v28 = vrot.slane %v226_v26, 4  ;;  %v221_v29 = vadd.f32 %v220_v27, %v219_v25 }
  0x56   : > { %v228_v30 = vadd.f32 %v227_v28, %v226_v26  ;;  %v222_v31 = vrot.slane %v221_v29, 2 }
  0x58   : > { %v229_v32 = vrot.slane %v228_v30, 2  ;;  %v223_v33 = vadd.f32 %v222_v31, %v221_v29 }
  0x5a   : > { %v230_v34 = vadd.f32 %v229_v32, %v228_v30  ;;  %v224_v35 = vrot.slane %v223_v33, 1 }
  0x5c   : > { %v231_v36 = vrot.slane %v230_v34, 1  ;;  %v225_v37 = vadd.f32 %v224_v35, %v223_v33 }
  0x5e   : > { %v232_v38 = vadd.f32 %v231_v36, %v230_v34  ;;  %v233_v39 = vmul.f32 0.25, %v225_v37 }
  0x60   : > { %v234_v40 = vmul.f32 0.25, %v232_v38  ;;  %v235_v41 = vadd.f32 1e-06, %v233_v39 }
  0x62   : > { %v236_v42 = vadd.f32 1e-06, %v234_v40  ;;  %422 = vrsqrt.f32 %v235_v41 }
  0x64   : > { %424 = vrsqrt.f32 %v236_v42 }
  0x6c   : > { %v423_v46 = vpop.eup %422 }
  0x6e   : > { %v425_v49 = vpop.eup %424 }
  0x6f   : > { %v241_v51 = vcombine.low %v423_v46, %v425_v49 }
  0x71   : > { %v243_v53 = vmul.f32 %v241_v51, %v214_v22 }
  0xb8   : > { %v247_v52 = vpop.permute.xlu0 %246 }
  0xb9   : > { %v254_v54 = vrot.slane %v247_v52, %v253_v50 }
  0xbb   : > { %v256_v56 = vmul.f32 %v254_v54, %v243_v53 }
  0xbc   : > { %v260_v55 = vpop.permute.xlu0 %259 }
  0xbd   : > { %v267_v57 = vrot.slane %v260_v55, %v253_v50 }
  0xbf   : > { %v269_v58 = vadd.f32 %v267_v57, %v256_v56 }
  0xc1   : > { %270 = vst [vmem:[%s186_s10] sm:$0xff] %v269_v58 }
  0xc2   : > { %469 = shalt.err (!%p466_p4)
}
  0xc3   : > { %s470_s29 = scalar_lea.hbm %s679_s20, 128  ;;  %s474_s7 = scalar_lea.hbm %s726_s3, 256 }
  0xc4   : > { %p471_p5 = scmp.ne.s32.totalorder %s679_s20, %s470_s29  ;;  %p475_p0 = scmp.lt.u32.totalorder %s679_s20, %s726_s3 }
  0xc5   : > { %p476_p1 = scmp.lt.u32.totalorder %s474_s7, %s470_s29  ;;  %p478_p6 = scmp.lt.u32.totalorder %s470_s29, %s679_s20 }
  0xc6   : > { %p472_p8 = pnand %p471_p5, %p735_p11 }
  0xc7   : > { %p477_p3 = por %p476_p1, %p475_p0 }
  0xc8   : > { %p473_p9 = pneg %p472_p8 }
  0xc9   : > { %p479_p12 = por %p478_p6, %p477_p3 }
  0xcb   : > { %p480_p13 = pnand %p479_p12, %p473_p9 }
  0xcd   : > { %483 = shalt.err (!%p480_p13)
}
  0xce   : > { %374 = dma.vmem_to_hbm [thread:$0]  (%p735_p11), %s681_s11, 128, %s679_s20, %s272_s22  }
  0xcf PF: > { %s298_s8 = sand.u32 1, %s510_s12   ;;  %p736_p7 = scmp.ne.s32.totalorder %s731_s25, 0 }
  0xd0   : > { %p737_p10 = scmp.ge.s32.totalorder %s522_s15, 2  ;;  %s299_s9 = scalar_lea.sflag [#allocation4], %s298_s8 }
  0xd2   : > { %p381_p2 = pnand %p737_p10, %p736_p7 }
  0xd4   : > { %505 = dma.done.wait (!%p381_p2), %s299_s9, 128  }
  0xd5   : > { %507 = vsyncadd (!%p381_p2), %s299_s9, 4294967168  ;;  %p16_p4 = scmp.ge.s32.totalorder %s573_s18, 4   ;;  %s738_s12 = smov %s514_s13 }
  0xd6   : > { %s739_s13 = smov %s518_s14  ;;  %s740_s14 = smov %s585_s21 }
  0xd7   : > { %s741_s15 = smov %s573_s18  ;;  %18 = sbr.rel (!%p16_p4) target bundleno = 5 (0x5), region = 77 }
  0xde   :  { %304 = vsyncpa [#allocation3], 1 }
  0xdf   :  { %306 = vsyncpa [#allocation3 + $0x1], 1 }
  0xe0   :  { %307 = vsyncpa [#allocation4], 1 }
  0xe1   :  { %309 = vsyncpa [#allocation4 + $0x1], 1 }

</bundles_post_ra>
